<compile_context>
chip_gen: v6e
topology: v6e:2x2x1
jax: 0.10.0
libtpu: 0.0.40
codegen_flags: <defaults>
</compile_context>

<pallas_src>
import functools

import jax
import jax.numpy as jnp
from jax.experimental import pallas as pl
from jax.experimental.pallas import tpu as pltpu

LANES = 128
SUBLANES = 8


def _round_up(n, m):
    return ((n + m - 1) // m) * m


# ----------------------------------------------------------------------------
# Kernel 1: fused gated-conv stack (all layers, one pallas_call)
# ----------------------------------------------------------------------------
def _gated_stack_kernel(x_ref, w_ref, b_ref, o_ref, h_sc, res_sc, *, res_block_cnt):
    """One grid step == one gated causal-conv layer for one batch element.

    grid = (B, L); layer axis is innermost ("arbitrary") so h_sc/res_sc carry
    the activation across layers while per-layer weights stream.

    x_ref  : (1, T, C)       embedding output (bf16), only read at layer 0
    w_ref  : (1, kw*C, 2*C)  fused (conv | gate) im2col weights, bf16
    b_ref  : (1, 1, 2*C)     fused bias (conv_bias + b_l | gate_bias + c_l), f32
    o_ref  : (1, T, C)       final hidden (bf16), written at the last layer
    h_sc   : (T, C) f32      current activation (VMEM-resident across layers)
    res_sc : (T, C) f32      residual carry
    """
    l = pl.program_id(1)
    n_total = pl.num_programs(1)
    T, C = h_sc.shape
    kw = w_ref.shape[1] // C

    @pl.when(l == 0)
    def _():
        h_sc[...] = x_ref[0].astype(jnp.float32)

    h = h_sc[...]                                                 # (T, C) f32

    # Causal im2col: cols[t, k*C:(k+1)*C] = h[t + k - (kw-1)], zero where t+k < kw-1.
    if kw > 1:
        xpad = jnp.concatenate(
            [jnp.zeros((kw - 1, C), jnp.float32), h], axis=0)     # (T+kw-1, C)
        cols = jnp.concatenate([xpad[k:k + T, :] for k in range(kw)], axis=1)
    else:
        cols = h                                                  # (T, kw*C)

    ab = jnp.dot(cols.astype(jnp.bfloat16), w_ref[0],
                 preferred_element_type=jnp.float32) + b_ref[0]   # (T, 2C) f32
    a = ab[:, :C]
    g = ab[:, C:]
    hn = a * jax.nn.sigmoid(g)                                    # (T, C) f32

    # Residual schedule: PyTorch loop index i == l - 1 for l >= 1.
    is_res = jnp.logical_and(l >= 1, ((l - 1) % res_block_cnt) == 0)

    @pl.when(is_res)
    def _():
        hr = hn + res_sc[...]
        h_sc[...] = hr
        res_sc[...] = hr

    @pl.when(jnp.logical_not(is_res))
    def _():
        h_sc[...] = hn

    @pl.when(l == 0)
    def _():
        res_sc[...] = hn          # res_input = layer-0 output

    @pl.when(l == n_total - 1)
    def _():
        o_ref[0] = h_sc[...].astype(o_ref.dtype)


def gated_conv_stack(x, w_all, b_all, *, res_block_cnt):
    """x: (B, T, C) bf16; w_all: (L, kw*C, 2C) bf16; b_all: (L, 1, 2C) f32."""
    B, T, C = x.shape
    L, kwC, twoC = w_all.shape

    cost = pl.CostEstimate(
        flops=int(2 * B * L * T * kwC * twoC),
        transcendentals=int(B * L * T * C),
        bytes_accessed=int(2 * x.size + 2 * w_all.size + 4 * b_all.size + 2 * B * T * C),
    )
    kernel = functools.partial(_gated_stack_kernel, res_block_cnt=res_block_cnt)
    return pl.pallas_call(
        kernel,
        out_shape=jax.ShapeDtypeStruct((B, T, C), jnp.bfloat16),
        grid=(B, L),
        in_specs=[
            pl.BlockSpec((1, T, C), lambda b, l: (b, 0, 0)),       # fetched once per b
            pl.BlockSpec((1, kwC, twoC), lambda b, l: (l, 0, 0)),  # streams per layer
            pl.BlockSpec((1, 1, twoC), lambda b, l: (l, 0, 0)),
        ],
        out_specs=pl.BlockSpec((1, T, C), lambda b, l: (b, 0, 0)),
        scratch_shapes=[
            pltpu.VMEM((T, C), jnp.float32),   # h
            pltpu.VMEM((T, C), jnp.float32),   # residual carry
        ],
        compiler_params=pltpu.CompilerParams(
            dimension_semantics=("parallel", "arbitrary"),
            vmem_limit_bytes=48 * 1024 * 1024),
        cost_estimate=cost,
    )(x, w_all, b_all)


# ----------------------------------------------------------------------------
# Kernel 2: final linear, tiled over vocab, writes (V_tile, T) transposed blocks
# ----------------------------------------------------------------------------
def _fc_kernel(h_ref, w_ref, b_ref, o_ref):
    """h: (1, T, C) bf16; w: (C, Vt) bf16; b: (1, Vt) f32; o: (1, Vt, T) f32."""
    acc = jnp.dot(h_ref[0], w_ref[...],
                  preferred_element_type=jnp.float32) + b_ref[...]   # (T, Vt)
    o_ref[0] = acc.T      # emit the PyTorch (V, T) layout directly (no XLA transpose)


def _pick_v_tile(v):
    for cand in (2048, 1024, 512, 256, 128):
        if v % cand == 0:
            return cand
    return v


def fc_layer(h, w, b):
    """h: (B, T, C) bf16; w: (C, V) bf16; b: (1, V) f32 -> (B, V, T) f32."""
    B, T, C = h.shape
    V = w.shape[1]
    Vt = _pick_v_tile(V)
    cost = pl.CostEstimate(
        flops=int(2 * B * T * C * V),
        transcendentals=0,
        bytes_accessed=int(2 * h.size + 2 * w.size + 4 * b.size + 4 * B * V * T),
    )
    return pl.pallas_call(
        _fc_kernel,
        out_shape=jax.ShapeDtypeStruct((B, V, T), jnp.float32),
        grid=(B, V // Vt),
        in_specs=[
            pl.BlockSpec((1, T, C), lambda bi, vi: (bi, 0, 0)),
            pl.BlockSpec((C, Vt), lambda bi, vi: (0, vi)),
            pl.BlockSpec((1, Vt), lambda bi, vi: (0, vi)),
        ],
        out_specs=pl.BlockSpec((1, Vt, T), lambda bi, vi: (bi, vi, 0)),
        compiler_params=pltpu.CompilerParams(
            dimension_semantics=("parallel", "parallel"),
            vmem_limit_bytes=48 * 1024 * 1024),
        cost_estimate=cost,
    )(h, w, b)


# ----------------------------------------------------------------------------
# Parameter construction (deterministic; mirrors GatedCNN.__init__, lane-padded)
# ----------------------------------------------------------------------------
def init_params(key, vocab_size, embed_dim, kernel_width, out_channel, n_layers):
    kw = kernel_width
    C = _round_up(max(embed_dim, out_channel), LANES)   # padded channel width
    V = _round_up(vocab_size, LANES)                    # padded vocab width
    L = n_layers + 1

    ks = iter(jax.random.split(key, 3 + 4 * L))

    emb = jnp.zeros((vocab_size, C), jnp.float32)
    emb = emb.at[:, :embed_dim].set(
        jax.random.normal(next(ks), (vocab_size, embed_dim), jnp.float32) * 0.1)
    emb = emb.at[0].set(0.0)                            # padding_idx = 0

    # Per-layer fused weights: rows = (tap k, in-channel), cols = (conv | gate).
    w_all = jnp.zeros((L, kw, C, 2 * C), jnp.float32)
    b_all = jnp.zeros((L, 1, 2 * C), jnp.float32)
    for l in range(L):
        cin = embed_dim if l == 0 else out_channel
        wc = jax.random.normal(next(ks), (out_channel, cin, kw), jnp.float32) * 0.1
        bc = jax.random.normal(next(ks), (out_channel,), jnp.float32) * 0.01
        wg = jax.random.normal(next(ks), (out_channel, cin, kw), jnp.float32) * 0.1
        bg = jax.random.normal(next(ks), (out_channel,), jnp.float32) * 0.01
        # b_l / c_l parameters are zero-initialized in the reference -> folded as-is.
        w_all = w_all.at[l, :, :cin, :out_channel].set(jnp.transpose(wc, (2, 1, 0)))
        w_all = w_all.at[l, :, :cin, C:C + out_channel].set(jnp.transpose(wg, (2, 1, 0)))
        b_all = b_all.at[l, 0, :out_channel].set(bc)
        b_all = b_all.at[l, 0, C:C + out_channel].set(bg)
    w_all = w_all.reshape(L, kw * C, 2 * C)

    fc_w = jnp.zeros((C, V), jnp.float32)
    fc_w = fc_w.at[:out_channel, :vocab_size].set(
        (jax.random.normal(next(ks), (vocab_size, out_channel), jnp.float32) * 0.1).T)
    fc_b = jnp.zeros((1, V), jnp.float32)
    fc_b = fc_b.at[0, :vocab_size].set(
        jax.random.normal(next(ks), (vocab_size,), jnp.float32) * 0.01)

    return {
        "emb": emb.astype(jnp.bfloat16),
        "w_all": w_all.astype(jnp.bfloat16),
        "b_all": b_all,
        "fc_w": fc_w.astype(jnp.bfloat16),
        "fc_b": fc_b,
    }


# ----------------------------------------------------------------------------
# Forward pass (embedding gather in JAX glue, hot path in two Pallas kernels)
# ----------------------------------------------------------------------------
@functools.partial(jax.jit, static_argnames=("vocab_size", "res_block_cnt"))
def gated_cnn_forward(params, seq, *, vocab_size, res_block_cnt):
    B, T = seq.shape
    x = params["emb"][seq]                         # (B, T, C) bf16, gather glue
    T_pad = _round_up(T, SUBLANES)
    if T_pad != T:                                 # trailing pad only -> causal-safe
        x = jnp.pad(x, ((0, 0), (0, T_pad - T), (0, 0)))

    h = gated_conv_stack(x, params["w_all"], params["b_all"],
                         res_block_cnt=res_block_cnt)          # (B, T_pad, C) bf16
    logits = fc_layer(h, params["fc_w"], params["fc_b"])       # (B, V_pad, T_pad) f32
    return logits[:, :vocab_size, :T]                          # (B, V, T) like PyTorch


# ----------------------------------------------------------------------------
# Pure-JAX reference (same padded params) for a correctness check
# ----------------------------------------------------------------------------
def _reference_forward(params, seq, *, vocab_size, res_block_cnt):
    emb = params["emb"].astype(jnp.float32)
    w_all = params["w_all"].astype(jnp.float32)
    b_all = params["b_all"]
    fc_w = params["fc_w"].astype(jnp.float32)
    fc_b = params["fc_b"]
    B, T = seq.shape
    C = emb.shape[1]
    L, kwC, _ = w_all.shape
    kw = kwC // C

    x = emb[seq]                                             # (B, T, C)

    def layer(h, l):
        hp = jnp.pad(h, ((0, 0), (kw - 1, 0), (0, 0)))
        cols = jnp.concatenate([hp[:, k:k + T, :] for k in range(kw)], axis=-1)
        ab = jnp.einsum("btk,kc->btc", cols, w_all[l]) + b_all[l]
        return ab[..., :C] * jax.nn.sigmoid(ab[..., C:])

    h = layer(x, 0)
    res = h
    for i in range(L - 1):
        h = layer(h, i + 1)
        if i % res_block_cnt == 0:
            h = h + res
            res = h
    logits = jnp.einsum("btc,cv->btv", h, fc_w) + fc_b
    return jnp.transpose(logits, (0, 2, 1))[:, :vocab_size, :]


if __name__ == "__main__":
    vocab_size = 32
    embed_dim = 16
    kernel_width = 3
    out_channel = 16
    n_layers = 3
    res_block_cnt = 2
    batch, seq_len = 2, 8

    key = jax.random.PRNGKey(0)
    pkey, skey = jax.random.split(key)
    params = init_params(pkey, vocab_size, embed_dim, kernel_width,
                         out_channel, n_layers)
    seq = jax.random.randint(skey, (batch, seq_len), 0, vocab_size, dtype=jnp.int32)

    out = gated_cnn_forward(params, seq, vocab_size=vocab_size,
                            res_block_cnt=res_block_cnt)
    jax.block_until_ready(out)
    assert out.shape == (batch, vocab_size, seq_len), out.shape

    ref = _reference_forward(params, seq, vocab_size=vocab_size,
                             res_block_cnt=res_block_cnt)
    max_diff = float(jnp.max(jnp.abs(out - ref)))
    assert max_diff < 1e-2, f"mismatch vs reference: {max_diff}"

    print("KERNEL_OK")
</pallas_src>

<mosaic_0001>
module attributes {stable_mosaic.version = 11 : i64} {
  func.func @_fc_kernel(%arg0: i32, %arg1: i32, %arg2: memref<1x8x128xbf16, #tpu.memory_space<vmem>>, %arg3: memref<128x128xbf16, #tpu.memory_space<vmem>>, %arg4: memref<1x128xf32, #tpu.memory_space<vmem>>, %arg5: memref<1x128x8xf32, #tpu.memory_space<vmem>>) attributes {dimension_semantics = [#tpu.dimension_semantics<parallel>, #tpu.dimension_semantics<parallel>], iteration_bounds = array<i64: 2, 1>, scalar_prefetch = 0 : i64, scratch_operands = 0 : i64, tpu.core_type = #tpu.core_type<tc>, window_params = [{transform_indices = @transform_0, window_bounds = array<i64: 1, 8, 128>}, {transform_indices = @transform_1, window_bounds = array<i64: 128, 128>}, {transform_indices = @transform_2, window_bounds = array<i64: 1, 128>}, {transform_indices = @transform_3, window_bounds = array<i64: 1, 128, 8>}]} {
    %c0 = arith.constant 0 : index
    %c0_0 = arith.constant 0 : index
    %c0_1 = arith.constant 0 : index
    %0 = vector.load %arg2[%c0, %c0_0, %c0_1] : memref<1x8x128xbf16, #tpu.memory_space<vmem>>, vector<1x8x128xbf16>
    %1 = vector.shape_cast %0 : vector<1x8x128xbf16> to vector<8x128xbf16>
    %c0_2 = arith.constant 0 : index
    %c0_3 = arith.constant 0 : index
    %2 = vector.load %arg3[%c0_2, %c0_3] : memref<128x128xbf16, #tpu.memory_space<vmem>>, vector<128x128xbf16>
    %cst = arith.constant dense<0.000000e+00> : vector<8x128xf32>
    %3 = tpu.matmul %1, %2, %cst {dimension_numbers = #tpu.dot_dimension_numbers<[1], [0], [0], [1], [0, 0, 1, 1], [], []>} : vector<8x128xbf16>, vector<128x128xbf16>, vector<8x128xf32> -> vector<8x128xf32>
    %c0_4 = arith.constant 0 : index
    %c0_5 = arith.constant 0 : index
    %4 = vector.load %arg4[%c0_4, %c0_5] : memref<1x128xf32, #tpu.memory_space<vmem>>, vector<1x128xf32>
    %5 = vector.broadcast %4 : vector<1x128xf32> to vector<8x128xf32>
    %6 = arith.addf %3, %5 : vector<8x128xf32>
    %7 = tpu.transpose %6, [1, 0] : vector<8x128xf32> -> vector<128x8xf32>
    %c0_6 = arith.constant 0 : index
    %c0_7 = arith.constant 0 : index
    %c0_8 = arith.constant 0 : index
    %8 = vector.load %arg5[%c0_6, %c0_7, %c0_8] : memref<1x128x8xf32, #tpu.memory_space<vmem>>, vector<1x128x8xf32>
    %9 = vector.shape_cast %8 : vector<1x128x8xf32> to vector<128x8xf32>
    %10 = vector.shape_cast %7 : vector<128x8xf32> to vector<1x128x8xf32>
    tpu.vector_store %arg5[%c0_6, %c0_7, %c0_8], %10 {strides = array<i32>} : memref<1x128x8xf32, #tpu.memory_space<vmem>>, vector<1x128x8xf32>,
    return
  }
  func.func @transform_0(%arg0: i32, %arg1: i32) -> (i32, i32, i32) {
    %c0_i32 = arith.constant 0 : i32
    %c0_i32_0 = arith.constant 0 : i32
    %c0_i32_1 = arith.constant 0 : i32
    return %arg0, %c0_i32, %c0_i32_0 : i32, i32, i32
  }
  func.func @transform_1(%arg0: i32, %arg1: i32) -> (i32, i32) {
    %c0_i32 = arith.constant 0 : i32
    %c0_i32_0 = arith.constant 0 : i32
    return %c0_i32, %arg1 : i32, i32
  }
  func.func @transform_2(%arg0: i32, %arg1: i32) -> (i32, i32) {
    %c0_i32 = arith.constant 0 : i32
    %c0_i32_0 = arith.constant 0 : i32
    return %c0_i32, %arg1 : i32, i32
  }
  func.func @transform_3(%arg0: i32, %arg1: i32) -> (i32, i32, i32) {
    %c0_i32 = arith.constant 0 : i32
    %c0_i32_0 = arith.constant 0 : i32
    return %arg0, %arg1, %c0_i32 : i32, i32, i32
  }
}

module attributes {stable_mosaic.version = 11 : i64} {
  func.func @_gated_stack_kernel(%arg0: i32, %arg1: i32, %arg2: memref<1x8x128xbf16, #tpu.memory_space<vmem>>, %arg3: memref<1x384x256xbf16, #tpu.memory_space<vmem>>, %arg4: memref<1x1x256xf32, #tpu.memory_space<vmem>>, %arg5: memref<1x8x128xbf16, #tpu.memory_space<vmem>>, %arg6: memref<8x128xf32, #tpu.memory_space<vmem>>, %arg7: memref<8x128xf32, #tpu.memory_space<vmem>>) attributes {dimension_semantics = [#tpu.dimension_semantics<parallel>, #tpu.dimension_semantics<arbitrary>], iteration_bounds = array<i64: 2, 4>, scalar_prefetch = 0 : i64, scratch_operands = 2 : i64, tpu.core_type = #tpu.core_type<tc>, window_params = [{transform_indices = @transform_0, window_bounds = array<i64: 1, 8, 128>}, {transform_indices = @transform_1, window_bounds = array<i64: 1, 384, 256>}, {transform_indices = @transform_2, window_bounds = array<i64: 1, 1, 256>}, {transform_indices = @transform_3, window_bounds = array<i64: 1, 8, 128>}]} {
    %c0_i32 = arith.constant 0 : i32
    %0 = arith.cmpi eq, %arg1, %c0_i32 : i32
    %1 = arith.extui %0 : i1 to i32
    %c0_i32_0 = arith.constant 0 : i32
    %2 = arith.cmpi ne, %1, %c0_i32_0 : i32
    scf.if %2 {
      %c0_22 = arith.constant 0 : index
      %c0_23 = arith.constant 0 : index
      %c0_24 = arith.constant 0 : index
      %51 = vector.load %arg2[%c0_22, %c0_23, %c0_24] : memref<1x8x128xbf16, #tpu.memory_space<vmem>>, vector<1x8x128xbf16>
      %52 = vector.shape_cast %51 : vector<1x8x128xbf16> to vector<8x128xbf16>
      %53 = arith.extf %52 : vector<8x128xbf16> to vector<8x128xf32>
      %c0_25 = arith.constant 0 : index
      %c0_26 = arith.constant 0 : index
      %54 = vector.load %arg6[%c0_25, %c0_26] : memref<8x128xf32, #tpu.memory_space<vmem>>, vector<8x128xf32>
      tpu.vector_store %arg6[%c0_25, %c0_26], %53 {strides = array<i32>} : memref<8x128xf32, #tpu.memory_space<vmem>>, vector<8x128xf32>,
    } else {
    }
    %c0 = arith.constant 0 : index
    %c0_1 = arith.constant 0 : index
    %3 = vector.load %arg6[%c0, %c0_1] : memref<8x128xf32, #tpu.memory_space<vmem>>, vector<8x128xf32>
    %cst = arith.constant 0.000000e+00 : f32
    %4 = vector.broadcast %cst : f32 to vector<2x128xf32>
    %5 = tpu.concatenate %4, %3 in 0 : vector<2x128xf32>, vector<8x128xf32> -> vector<10x128xf32>
    %6 = vector.extract_strided_slice %5 {offsets = [0, 0], sizes = [8, 128], strides = [1, 1]} : vector<10x128xf32> to vector<8x128xf32>
    %7 = vector.extract_strided_slice %5 {offsets = [1, 0], sizes = [8, 128], strides = [1, 1]} : vector<10x128xf32> to vector<8x128xf32>
    %8 = vector.extract_strided_slice %5 {offsets = [2, 0], sizes = [8, 128], strides = [1, 1]} : vector<10x128xf32> to vector<8x128xf32>
    %9 = tpu.concatenate %6, %7, %8 in 1 : vector<8x128xf32>, vector<8x128xf32>, vector<8x128xf32> -> vector<8x384xf32>
    %10 = arith.truncf %9 : vector<8x384xf32> to vector<8x384xbf16>
    %c0_2 = arith.constant 0 : index
    %c0_3 = arith.constant 0 : index
    %c0_4 = arith.constant 0 : index
    %11 = vector.load %arg3[%c0_2, %c0_3, %c0_4] : memref<1x384x256xbf16, #tpu.memory_space<vmem>>, vector<1x384x256xbf16>
    %12 = vector.shape_cast %11 : vector<1x384x256xbf16> to vector<384x256xbf16>
    %cst_5 = arith.constant dense<0.000000e+00> : vector<8x256xf32>
    %13 = tpu.matmul %10, %12, %cst_5 {dimension_numbers = #tpu.dot_dimension_numbers<[1], [0], [0], [1], [0, 0, 1, 1], [], []>} : vector<8x384xbf16>, vector<384x256xbf16>, vector<8x256xf32> -> vector<8x256xf32>
    %c0_6 = arith.constant 0 : index
    %c0_7 = arith.constant 0 : index
    %c0_8 = arith.constant 0 : index
    %14 = vector.load %arg4[%c0_6, %c0_7, %c0_8] : memref<1x1x256xf32, #tpu.memory_space<vmem>>, vector<1x1x256xf32>
    %15 = vector.shape_cast %14 : vector<1x1x256xf32> to vector<1x256xf32>
    %16 = vector.broadcast %15 : vector<1x256xf32> to vector<8x256xf32>
    %17 = arith.addf %13, %16 : vector<8x256xf32>
    %18 = vector.extract_strided_slice %17 {offsets = [0, 0], sizes = [8, 128], strides = [1, 1]} : vector<8x256xf32> to vector<8x128xf32>
    %19 = vector.extract_strided_slice %17 {offsets = [0, 128], sizes = [8, 128], strides = [1, 1]} : vector<8x256xf32> to vector<8x128xf32>
    %20 = arith.negf %19 : vector<8x128xf32>
    %21 = math.exp %20 : vector<8x128xf32>
    %cst_9 = arith.constant 1.000000e+00 : f32
    %22 = vector.broadcast %cst_9 : f32 to vector<8x128xf32>
    %23 = arith.addf %22, %21 : vector<8x128xf32>
    %24 = arith.divf %22, %23 : vector<8x128xf32>
    %25 = arith.mulf %18, %24 : vector<8x128xf32>
    %c1_i32 = arith.constant 1 : i32
    %26 = arith.cmpi sge, %arg1, %c1_i32 : i32
    %c1_i32_10 = arith.constant 1 : i32
    %27 = arith.subi %arg1, %c1_i32_10 : i32
    %c2_i32 = arith.constant 2 : i32
    %c0_i32_11 = arith.constant 0 : i32
    %28 = arith.cmpi eq, %c2_i32, %c0_i32_11 : i32
    %c1_i32_12 = arith.constant 1 : i32
    %29 = arith.select %28, %c1_i32_12, %c2_i32 : i32
    %30 = arith.remsi %27, %29 : i32
    %c0_i32_13 = arith.constant 0 : i32
    %31 = arith.cmpi ne, %30, %c0_i32_13 : i32
    %c0_i32_14 = arith.constant 0 : i32
    %32 = arith.cmpi slt, %30, %c0_i32_14 : i32
    %c0_i32_15 = arith.constant 0 : i32
    %33 = arith.cmpi slt, %29, %c0_i32_15 : i32
    %34 = arith.xori %32, %33 : i1
    %35 = arith.andi %34, %31 : i1
    %36 = arith.addi %30, %29 : i32
    %37 = arith.select %35, %36, %30 : i32
    %c0_i32_16 = arith.constant 0 : i32
    %38 = arith.cmpi eq, %37, %c0_i32_16 : i32
    %39 = arith.andi %26, %38 : i1
    %40 = arith.extui %39 : i1 to i32
    %c0_i32_17 = arith.constant 0 : i32
    %41 = arith.cmpi ne, %40, %c0_i32_17 : i32
    scf.if %41 {
      %c0_22 = arith.constant 0 : index
      %c0_23 = arith.constant 0 : index
      %51 = vector.load %arg7[%c0_22, %c0_23] : memref<8x128xf32, #tpu.memory_space<vmem>>, vector<8x128xf32>
      %52 = arith.addf %25, %51 : vector<8x128xf32>
      %c0_24 = arith.constant 0 : index
      %c0_25 = arith.constant 0 : index
      %53 = vector.load %arg6[%c0_24, %c0_25] : memref<8x128xf32, #tpu.memory_space<vmem>>, vector<8x128xf32>
      tpu.vector_store %arg6[%c0_24, %c0_25], %52 {strides = array<i32>} : memref<8x128xf32, #tpu.memory_space<vmem>>, vector<8x128xf32>,
      %c0_26 = arith.constant 0 : index
      %c0_27 = arith.constant 0 : index
      %54 = vector.load %arg7[%c0_26, %c0_27] : memref<8x128xf32, #tpu.memory_space<vmem>>, vector<8x128xf32>
      tpu.vector_store %arg7[%c0_26, %c0_27], %52 {strides = array<i32>} : memref<8x128xf32, #tpu.memory_space<vmem>>, vector<8x128xf32>,
    } else {
    }
    %true = arith.constant true
    %42 = arith.xori %39, %true : i1
    %43 = arith.extui %42 : i1 to i32
    %c0_i32_18 = arith.constant 0 : i32
    %44 = arith.cmpi ne, %43, %c0_i32_18 : i32
    scf.if %44 {
      %c0_22 = arith.constant 0 : index
      %c0_23 = arith.constant 0 : index
      %51 = vector.load %arg6[%c0_22, %c0_23] : memref<8x128xf32, #tpu.memory_space<vmem>>, vector<8x128xf32>
      tpu.vector_store %arg6[%c0_22, %c0_23], %25 {strides = array<i32>} : memref<8x128xf32, #tpu.memory_space<vmem>>, vector<8x128xf32>,
    } else {
    }
    %c0_i32_19 = arith.constant 0 : i32
    %45 = arith.cmpi eq, %arg1, %c0_i32_19 : i32
    %46 = arith.extui %45 : i1 to i32
    %c0_i32_20 = arith.constant 0 : i32
    %47 = arith.cmpi ne, %46, %c0_i32_20 : i32
    scf.if %47 {
      %c0_22 = arith.constant 0 : index
      %c0_23 = arith.constant 0 : index
      %51 = vector.load %arg7[%c0_22, %c0_23] : memref<8x128xf32, #tpu.memory_space<vmem>>, vector<8x128xf32>
      tpu.vector_store %arg7[%c0_22, %c0_23], %25 {strides = array<i32>} : memref<8x128xf32, #tpu.memory_space<vmem>>, vector<8x128xf32>,
    } else {
    }
    %c3_i32 = arith.constant 3 : i32
    %48 = arith.cmpi eq, %arg1, %c3_i32 : i32
    %49 = arith.extui %48 : i1 to i32
    %c0_i32_21 = arith.constant 0 : i32
    %50 = arith.cmpi ne, %49, %c0_i32_21 : i32
    scf.if %50 {
      %c0_22 = arith.constant 0 : index
      %c0_23 = arith.constant 0 : index
      %51 = vector.load %arg6[%c0_22, %c0_23] : memref<8x128xf32, #tpu.memory_space<vmem>>, vector<8x128xf32>
      %52 = arith.truncf %51 : vector<8x128xf32> to vector<8x128xbf16>
      %c0_24 = arith.constant 0 : index
      %c0_25 = arith.constant 0 : index
      %c0_26 = arith.constant 0 : index
      %53 = vector.load %arg5[%c0_24, %c0_25, %c0_26] : memref<1x8x128xbf16, #tpu.memory_space<vmem>>, vector<1x8x128xbf16>
      %54 = vector.shape_cast %53 : vector<1x8x128xbf16> to vector<8x128xbf16>
      %55 = vector.shape_cast %52 : vector<8x128xbf16> to vector<1x8x128xbf16>
      tpu.vector_store %arg5[%c0_24, %c0_25, %c0_26], %55 {strides = array<i32>} : memref<1x8x128xbf16, #tpu.memory_space<vmem>>, vector<1x8x128xbf16>,
    } else {
    }
    return
  }
  func.func @transform_0(%arg0: i32, %arg1: i32) -> (i32, i32, i32) {
    %c0_i32 = arith.constant 0 : i32
    %c0_i32_0 = arith.constant 0 : i32
    %c0_i32_1 = arith.constant 0 : i32
    return %arg0, %c0_i32, %c0_i32_0 : i32, i32, i32
  }
  func.func @transform_1(%arg0: i32, %arg1: i32) -> (i32, i32, i32) {
    %c0_i32 = arith.constant 0 : i32
    %c0_i32_0 = arith.constant 0 : i32
    %c0_i32_1 = arith.constant 0 : i32
    return %arg1, %c0_i32, %c0_i32_0 : i32, i32, i32
  }
  func.func @transform_2(%arg0: i32, %arg1: i32) -> (i32, i32, i32) {
    %c0_i32 = arith.constant 0 : i32
    %c0_i32_0 = arith.constant 0 : i32
    %c0_i32_1 = arith.constant 0 : i32
    return %arg1, %c0_i32, %c0_i32_0 : i32, i32, i32
  }
  func.func @transform_3(%arg0: i32, %arg1: i32) -> (i32, i32, i32) {
    %c0_i32 = arith.constant 0 : i32
    %c0_i32_0 = arith.constant 0 : i32
    %c0_i32_1 = arith.constant 0 : i32
    return %arg0, %c0_i32, %c0_i32_0 : i32, i32, i32
  }
}

</mosaic_0001>

<bundles_post_ra>
// kernel: gated_cnn_forward.3
= control target key start
LH: loop header
LB: loop body
LE: loop exit
PB: predicated region body
PF: predicated region fallthrough
CT: control target
= control target key end

     0   :  { %s623_s12 = smov 0   ;;  %s625_s13 = smov 0   ;;  %s721_s0 = inlined_call_operand.vmem [shape: bf16[2,8,128], index: 0, kind: input, shape index: {}]   ;;  %s722_s1 = inlined_call_operand.vmem [shape: bf16[128,128], index: 1, kind: input, shape index: {}]   ;;  %s723_s2 = inlined_call_operand.vmem [shape: f32[1,128], index: 2, kind: input, shape index: {}]   ;;  %s724_s3 = inlined_call_operand.vmem [shape: f32[2,128,8], index: 3, kind: output, shape index: {}]  }
   0x1   :  { %s627_s14 = smov 0  }
   0x2 LB: > { %s25_s15 = sadd.s32 1, %s595_s13  ;;  %p498_p0 = scmp.ge.s32.totalorder %s599_s14, 1  ;;  %s599_s14 = sphi %s627_s14, %s13_s14   ;;  %s595_s13 = sphi %s625_s13, %s726_s13   ;;  %s591_s12 = sphi %s623_s12, %s725_s12  }
   0x3   : > { %p27_p1 = scmp.ge.s32.totalorder %s25_s15, 2  ;;  %p167_p2 = scmp.lt.s32.totalorder %s599_s14, 3 }
   0x5   : > { %s728_s15 = smov (%p27_p1, %s25_s15), 0  ;;  %p168_p3 = pnand %p498_p0, %p167_p2 }
   0x6   : > { %p201_p4 = scmp.lt.s32.totalorder (!%p168_p3), %s591_s12, 1 }
   0x7   : > { %171 = sbr.rel (%p168_p3) target bundleno = 426 (0x1aa), region = 32 }
   0xc   : > { %v569_v0 = vld [vmem:[%s722_s1 + $0x38] sm:$0xff]   ;;  %v601_v1 = vmov 0.0   ;;  %v570_v2 = vld [vmem:[%s722_s1 + $0x30] sm:$0xff]   ;;  %vm602_vm0 = vmmov 0   ;;  %v571_v3 = vld [vmem:[%s722_s1 + $0x28] sm:$0xff]   ;;  %s730_s12 = smov (!%p201_p4, %s591_s12), 1 }
   0xd   : > { %523 = vmatprep.subr.bf16.mxu0 %v601_v1  ;;  %539 = vmatprep.mubr.msk.bf16.mxu0 %vm602_vm0, %v601_v1  ;;  %v572_v4 = vld [vmem:[%s722_s1 + $0x20] sm:$0xff]   ;;  %v573_v5 = vld [vmem:[%s722_s1 + $0x18] sm:$0xff]   ;;  %v574_v6 = vld [vmem:[%s722_s1 + $0x10] sm:$0xff]   ;;  %s499_s30 = sshll.u32 %s730_s12, 2  ;;  %s513_s11 = sshll.u32 %s730_s12, 7  ;;  %vm367_vm1 = vcmask 64512  }
   0xe   : > { %524 = vmatpush3.bf16.msra.mxu0 %v569_v0  ;;  %v575_v7 = vld [vmem:[%s722_s1 + $0x8] sm:$0xff]   ;;  %v576_v8 = vld [vmem:[%s722_s1] sm:$0xff]   ;;  %s204_s8 = scalar_lea.vmem %s721_s0, %s499_s30  ;;  %s678_s18 = scalar_lea.vmem %s724_s3, %s513_s11 }
   0xf   : > { %525 = vmatprep.subr.bf16.mxu0 %v601_v1  ;;  %v223_v9 = vld [vmem:[%s204_s8] sm:$0xf] }
  0x10   : > { %v502_v10 = vld [vmem:[%s723_s2] ss:$0 sm:$0xff] }
  0x12   : > { %526 = vmatpush3.bf16.msra.mxu0 %v570_v2 }
  0x13   : > { %527 = vmatprep.subr.bf16.mxu0 %v601_v1 }
  0x16   : > { %528 = vmatpush3.bf16.msra.mxu0 %v571_v3 }
  0x17   : > { %529 = vmatprep.subr.bf16.mxu0 %v601_v1 }
  0x1a   : > { %530 = vmatpush3.bf16.msra.mxu0 %v572_v4 }
  0x1b   : > { %531 = vmatprep.subr.bf16.mxu0 %v601_v1 }
  0x1e   : > { %532 = vmatpush3.bf16.msra.mxu0 %v573_v5 }
  0x1f   : > { %533 = vmatprep.subr.bf16.mxu0 %v601_v1 }
  0x22   : > { %534 = vmatpush3.bf16.msra.mxu0 %v574_v6 }
  0x23   : > { %535 = vmatprep.subr.bf16.mxu0 %v601_v1 }
  0x26   : > { %536 = vmatpush3.bf16.msra.mxu0 %v575_v7 }
  0x27   : > { %537 = vmatprep.subr.bf16.mxu0 %v601_v1 }
  0x2a   : > { %538 = vmatpush3.bf16.msra.mxu0 %v576_v8 }
  0x2d   : > { %540 = vmatmul.mubr.bf16.vlgmr.msra.gmra.mxu0 %v223_v9 }
  0xed   : > { %v329_v11 = vpop.f32.mrf.mxu0 }
  0xee   : > { %v330_v12 = vadd.f32 %v502_v10, %v329_v11 }
  0xef   : > { %v541_v13 = vpop.f32.mrf.mxu0 }
  0xf0   : > { %335 = vxpose.xlu0.b32.start.end [1/1] (short) %v330_v12, 128 }
  0xf1   : > { %v332_v14 = vpop.f32.mrf.mxu0 }
  0xf3   : > { %v542_v15 = vpop.f32.mrf.mxu0 }
 0x16c   : > { %v351_v16 = vpop.trf.xlu0 }
 0x16d   : > { %368 = vst.msk [vmem:[%s678_s18] sm:$0xff] %vm367_vm1, %v351_v16 }
 0x170   : > { %v352_v17 = vpop.trf.xlu0 }
 0x171   : > { %369 = vst.msk [vmem:[%s678_s18 + $0x8] sm:$0xff] %vm367_vm1, %v352_v17 }
 0x174   : > { %v353_v18 = vpop.trf.xlu0 }
 0x175   : > { %370 = vst.msk [vmem:[%s678_s18 + $0x10] sm:$0xff] %vm367_vm1, %v353_v18 }
 0x178   : > { %v354_v19 = vpop.trf.xlu0 }
 0x179   : > { %371 = vst.msk [vmem:[%s678_s18 + $0x18] sm:$0xff] %vm367_vm1, %v354_v19 }
 0x17c   : > { %v355_v20 = vpop.trf.xlu0 }
 0x17d   : > { %372 = vst.msk [vmem:[%s678_s18 + $0x20] sm:$0xff] %vm367_vm1, %v355_v20 }
 0x180   : > { %v356_v21 = vpop.trf.xlu0 }
 0x181   : > { %373 = vst.msk [vmem:[%s678_s18 + $0x28] sm:$0xff] %vm367_vm1, %v356_v21 }
 0x184   : > { %v357_v22 = vpop.trf.xlu0 }
 0x185   : > { %374 = vst.msk [vmem:[%s678_s18 + $0x30] sm:$0xff] %vm367_vm1, %v357_v22 }
 0x188   : > { %v358_v23 = vpop.trf.xlu0 }
 0x189   : > { %375 = vst.msk [vmem:[%s678_s18 + $0x38] sm:$0xff] %vm367_vm1, %v358_v23 }
 0x18c   : > { %v359_v24 = vpop.trf.xlu0 }
 0x18d   : > { %376 = vst.msk [vmem:[%s678_s18 + $0x40] sm:$0xff] %vm367_vm1, %v359_v24 }
 0x190   : > { %v360_v25 = vpop.trf.xlu0 }
 0x191   : > { %377 = vst.msk [vmem:[%s678_s18 + $0x48] sm:$0xff] %vm367_vm1, %v360_v25 }
 0x194   : > { %v361_v26 = vpop.trf.xlu0 }
 0x195   : > { %378 = vst.msk [vmem:[%s678_s18 + $0x50] sm:$0xff] %vm367_vm1, %v361_v26 }
 0x198   : > { %v362_v27 = vpop.trf.xlu0 }
 0x199   : > { %379 = vst.msk [vmem:[%s678_s18 + $0x58] sm:$0xff] %vm367_vm1, %v362_v27 }
 0x19c   : > { %v363_v28 = vpop.trf.xlu0 }
 0x19d   : > { %380 = vst.msk [vmem:[%s678_s18 + $0x60] sm:$0xff] %vm367_vm1, %v363_v28 }
 0x1a0   : > { %v364_v29 = vpop.trf.xlu0 }
 0x1a1   : > { %381 = vst.msk [vmem:[%s678_s18 + $0x68] sm:$0xff] %vm367_vm1, %v364_v29 }
 0x1a4   : > { %v365_v30 = vpop.trf.xlu0 }
 0x1a5   : > { %382 = vst.msk [vmem:[%s678_s18 + $0x70] sm:$0xff] %vm367_vm1, %v365_v30 }
 0x1a8   : > { %v366_v31 = vpop.trf.xlu0 }
 0x1a9   : > { %383 = vst.msk [vmem:[%s678_s18 + $0x78] sm:$0xff] %vm367_vm1, %v366_v31 }
 0x1aa PF: > { %s13_s14 = sadd.s32 1, %s599_s14   ;;  %s725_s12 = smov %s595_s13 }
 0x1ab   : > { %p10_p5 = scmp.ge.s32.totalorder %s13_s14, 4   ;;  %s726_s13 = smov %s728_s15 }
 0x1ad   :  { %12 = sbr.rel (!%p10_p5) target bundleno = 2 (0x2), region = 68 }

// kernel: gated_cnn_forward.2
= control target key start
LH: loop header
LB: loop body
LE: loop exit
PB: predicated region body
PF: predicated region fallthrough
CT: control target
= control target key end

     0   :  { %8 = vsyncpa [#allocation5], 0  ;;  %s1328_s0 = inlined_call_operand.vmem [shape: bf16[2,8,128], index: 0, kind: input, shape index: {}]   ;;  %s1329_s1 = inlined_call_operand.hbm [shape: bf16[4,384,256], index: 1, kind: input, shape index: {}]   ;;  %s1330_s2 = inlined_call_operand.vmem [shape: f32[4,1,256], index: 2, kind: input, shape index: {}]   ;;  %s1331_s3 = inlined_call_operand.vmem [shape: bf16[2,8,128], index: 3, kind: output, shape index: {}]  }
   0x1   :  { %10 = vsyncpa [#allocation5 + $0x1], 0  ;;  %s1135_s12 = smov 0   ;;  %s1137_s13 = smov 0  }
   0x2   :  { %s1139_s14 = smov 0   ;;  %s1141_s15 = smov 0  }
   0x3   :  { %s1143_s16 = smov 0   ;;  %s1145_s17 = smov 0  }
   0x4   :  { %s1147_s18 = smov 0   ;;  %s1149_s19 = smov 0  }
   0x5 LB: > { %s790_s20 = sadd.s32 4294967295, %s1109_s19   ;;  %s25_s21 = sadd.s32 1, %s1101_s17  ;;  %s1109_s19 = sphi %s1149_s19, %s16_s19   ;;  %s1105_s18 = sphi %s1147_s18, %s1341_s18   ;;  %s1101_s17 = sphi %s1145_s17, %s1340_s17   ;;  %s1097_s16 = sphi %s1143_s16, %s1339_s16   ;;  %s1093_s15 = sphi %s1141_s15, %s1338_s15   ;;  %s1089_s14 = sphi %s1139_s14, %s1337_s14   ;;  %s1085_s13 = sphi %s1137_s13, %s1336_s13   ;;  %s1081_s12 = sphi %s1135_s12, %s1335_s12  }
   0x6   : > { %p26_p0 = scmp.ge.s32.totalorder %s25_s21, 4  ;;  %s28_s22 = sadd.s32 1, %s1105_s18 }
   0x7   : > { %s61_s23 = sadd.s32 1, %s1089_s14  ;;  %p68_p1 = scmp.ne.s32.totalorder %s1089_s14, %s1085_s13 }
   0x8   : > { %s1343_s21 = smov (%p26_p0, %s25_s21), 0  ;;  %s1345_s22 = smov (!%p26_p0, %s28_s22), %s1105_s18 }
   0x9   : > { %s58_s24 = ssub.s32 %s1101_s17, %s1343_s21  ;;  %p69_p2 = scmp.eq.s32.totalorder %s1109_s19, 0 }
   0xa   : > { %p30_p3 = scmp.ge.s32.totalorder %s1345_s22, 2  ;;  %p59_p4 = scmp.eq.s32.totalorder %s58_s24, 0 }
   0xb   : > { %p70_p5 = por %p69_p2, %p68_p1  ;;  %p74_p6 = scmp.ne.s32.totalorder %s1085_s13, %s1081_s12 }
   0xc   : > { %s1347_s22 = smov (%p30_p3, %s1345_s22), 0  ;;  %p75_p7 = scmp.eq.s32.totalorder %s790_s20, 0 }
   0xd   : > { %s1189_s25 = scalar_select %p59_p4, %s1089_s14, %s61_s23  }
   0xe   : > { %p871_p8 = scmp.lt.s32.totalorder %s1109_s19, 8  ;;  %s157_s26 = sand.u32 1, %s1089_s14  }
   0xf   : > { %p1193_p9 = por %p75_p7, %p74_p6  ;;  %s862_s28 = smul.u32 384, %s157_s26 }
  0x10   : > { %p1197_p10 = pnand %p871_p8, %p70_p5  ;;  %s863_s30 = smul.u32 6144, %s1101_s17 }
  0x11   : > { %s161_s7 = scalar_lea.vmem [#allocation4], %s862_s28  ;;  %s158_s9 = scalar_lea.sflag [#allocation5], %s157_s26 }
  0x12   : > { %s167_s6 = scalar_lea.hbm %s1329_s1, %s863_s30  ;;  %s168_s8 = sshll.u32 %s161_s7, 4  ;;  %s169_s8 = int_to_ptr.vmem [resolvable:$true] %s168_s8 }
  0x13   : > { %p1017_p11 = pneg %p1197_p10  ;;  %s1028_s10 = scalar_lea.vmem %s169_s8, 6144 }
  0x14   : > { %p1029_p12 = scmp.ne.s32.totalorder %s169_s8, %s1028_s10  ;;  %s1111_s11 = smov [#allocation4]  }
  0x15   : > { %s1033_s12 = sshll.u32 %s1111_s11, 4  ;;  %s1034_s12 = int_to_ptr.vmem [resolvable:$false] %s1033_s12 }
  0x16   : > { %p1031_p13 = pnand %p1029_p12, %p1017_p11  ;;  %s1035_s20 = scalar_lea.vmem %s1034_s12, 12288 }
  0x17   : > { %p1036_p1 = scmp.lt.s32.totalorder %s169_s8, %s1034_s12  ;;  %p1037_p2 = scmp.lt.s32.totalorder %s1035_s20, %s1028_s10 }
  0x18   : > { %p1032_p0 = pneg %p1031_p13 }
  0x19   : > { %p1038_p3 = por %p1037_p2, %p1036_p1 }
  0x1b   : > { %p1039_p4 = pnand %p1038_p3, %p1032_p0 }
  0x1d   : > { %1042 = shalt.err (!%p1039_p4)
}
  0x1e   : > { %s1112_s23 = smov 128   ;;  %s1113_s24 = smov 8  }
  0x1f   : > { %870 = dma.hbm_to_vmem [thread:$0]  (!%p1197_p10), %s167_s6, 6144, %s169_s8, %s158_s9, %s1112_s23, %s1112_s23, %s1113_s24  }
  0x20   : > { %p795_p5 = scmp.ge.s32.totalorder %s1109_s19, 1  ;;  %p183_p6 = scmp.lt.s32.totalorder %s1109_s19, 9 }
  0x22   : > { %p184_p7 = pnand %p795_p5, %p183_p6 }
  0x23   : > { %s189_s26 = sand.u32 (!%p184_p7), 1, %s1085_s13  }
  0x24   : > { %187 = sbr.rel (%p184_p7) target bundleno = 378 (0x17a), region = 32  ;;  %s190_s30 = scalar_lea.sflag (!%p184_p7), [#allocation5], %s189_s26 }
  0x25   : > { %s864_s28 = smul.u32 (!%p184_p7), 384, %s189_s26 }
  0x27   : > { %s1212_s4 = scalar_lea.vmem (!%p184_p7), [#allocation4], %s864_s28 }
  0x29   : > { %1076 = dma.done.wait (%p1193_p9), %s190_s30, 6144  }
  0x2a   : > { %1078 = vsyncadd (%p1193_p9), %s190_s30, 4294961152  ;;  %p223_p8 = scmp.lt.s32.totalorder %s1097_s16, 1  ;;  %p227_p10 = scmp.lt.s32.totalorder %s1093_s15, 3 }
  0x2b   : > { %p799_p9 = scmp.ne.s32.totalorder %s1093_s15, 0 }
  0x2c   : > { %s1349_s16 = smov (!%p223_p8, %s1097_s16), 1 }
  0x2d   : > { %s228_s29 = scalar_select %p227_p10, %s1093_s15, 3 }
  0x2e   : > { %s796_s5 = sshll.u32 %s1349_s16, 2  ;;  %239 = sbr.rel (%p799_p9) target bundleno = 55 (0x37), region = 40 }
  0x2f   : > { %s226_s8 = scalar_lea.vmem %s1328_s0, %s796_s5  ;;  %s797_s9 = sshll.u32 %s228_s29, 1 }
  0x30   : > { %s1228_s12 = scalar_lea.vmem %s1330_s2, %s797_s9  ;;  %s1233_s23 = scalar_lea.vmem %s1331_s3, %s796_s5 }
  0x33   : > { %v240_v0 = vld [vmem:[%s226_s8] sm:$0xf] }
  0x34   : > { %v241_v1 = vunpack.c.l.bf16 %v240_v0 }
  0x36   : > { %242 = vst [vmem:[#allocation2] sm:$0xff] %v241_v1 }
  0x37 PF: > { %v939_v2 = vld [vmem:[%s1212_s4 + $0x74] ss:$8 sps:$4 sm:$0xff]   ;;  %v941_v3 = vld [vmem:[%s1212_s4 + $0x70] ss:$8 sps:$4 sm:$0xff]   ;;  %v1114_v4 = vmov 0   ;;  %vm247_vm0 = vcmask 1041408  }
  0x38   : > { %636 = vmatprep.mubr.bf16.mxu1 %v1114_v4  ;;  %563 = vmatprep.subr.bf16.mxu0 %v939_v2  ;;  %v942_v5 = vld [vmem:[%s1212_s4 + $0x64] ss:$8 sps:$4 sm:$0xff]   ;;  %v944_v6 = vld [vmem:[%s1212_s4 + $0x60] ss:$8 sps:$4 sm:$0xff]   ;;  %v945_v7 = vld [vmem:[%s1212_s4 + $0x54] ss:$8 sps:$4 sm:$0xff]  }
  0x39   : > { %564 = vmatpush1.bf16.msra.mxu0 %v941_v3  ;;  %v947_v8 = vld [vmem:[%s1212_s4 + $0x50] ss:$8 sps:$4 sm:$0xff]   ;;  %v948_v9 = vld [vmem:[%s1212_s4 + $0x44] ss:$8 sps:$4 sm:$0xff]   ;;  %v950_v10 = vld [vmem:[%s1212_s4 + $0x40] ss:$8 sps:$4 sm:$0xff]   ;;  %v313_v3 = vlaneseq }
  0x3a   : > { %565 = vmatprep.subr.bf16.mxu0 %v942_v5  ;;  %v962_v11 = vld [vmem:[%s1212_s4 + $0x174] ss:$8 sps:$4 sm:$0xff]   ;;  %v965_v12 = vld [vmem:[%s1212_s4 + $0x170] ss:$8 sps:$4 sm:$0xff]   ;;  %v968_v14 = vld [vmem:[%s1212_s4 + $0x164] ss:$8 sps:$4 sm:$0xff]  }
  0x3b   : > { %v951_v13 = vld [vmem:[%s1212_s4 + $0x34] ss:$8 sps:$4 sm:$0xff]   ;;  %604 = vmatprep.subr.bf16.mxu1 %v962_v11  ;;  %v971_v15 = vld [vmem:[%s1212_s4 + $0x160] ss:$8 sps:$4 sm:$0xff]   ;;  %v953_v16 = vld [vmem:[%s1212_s4 + $0x30] ss:$8 sps:$4 sm:$0xff]  }
  0x3c   : > { %605 = vmatpush1.bf16.msra.mxu1 %v965_v12  ;;  %v954_v17 = vld [vmem:[%s1212_s4 + $0x24] ss:$8 sps:$4 sm:$0xff]   ;;  %v974_v18 = vld [vmem:[%s1212_s4 + $0x154] ss:$8 sps:$4 sm:$0xff]   ;;  %v977_v19 = vld [vmem:[%s1212_s4 + $0x150] ss:$8 sps:$4 sm:$0xff]  }
  0x3d   : > { %566 = vmatpush1.bf16.msra.mxu0 %v944_v6  ;;  %606 = vmatprep.subr.bf16.mxu1 %v968_v14  ;;  %v956_v20 = vld [vmem:[%s1212_s4 + $0x20] ss:$8 sps:$4 sm:$0xff]   ;;  %v980_v21 = vld [vmem:[%s1212_s4 + $0x144] ss:$8 sps:$4 sm:$0xff]   ;;  %v957_v22 = vld [vmem:[%s1212_s4 + $0x14] ss:$8 sps:$4 sm:$0xff]  }
  0x3e   : > { %567 = vmatprep.subr.bf16.mxu0 %v945_v7  ;;  %v959_v23 = vld [vmem:[%s1212_s4 + $0x10] ss:$8 sps:$4 sm:$0xff]   ;;  %v983_v24 = vld [vmem:[%s1212_s4 + $0x140] ss:$8 sps:$4 sm:$0xff]   ;;  %v986_v25 = vld [vmem:[%s1212_s4 + $0x134] ss:$8 sps:$4 sm:$0xff]  }
  0x3f   : > { %v960_v26 = vld [vmem:[%s1212_s4 + $0x4] ss:$8 sps:$4 sm:$0xff]   ;;  %v989_v27 = vld [vmem:[%s1212_s4 + $0x130] ss:$8 sps:$4 sm:$0xff]   ;;  %v964_v28 = vld [vmem:[%s1212_s4] ss:$8 sps:$4 sm:$0xff]  }
  0x40   : > { %607 = vmatpush1.bf16.msra.mxu1 %v971_v15  ;;  %v992_v29 = vld [vmem:[%s1212_s4 + $0x124] ss:$8 sps:$4 sm:$0xff]   ;;  %v966_v30 = vld [vmem:[%s1212_s4 + $0xf4] ss:$8 sps:$4 sm:$0xff]   ;;  %v970_v31 = vld [vmem:[%s1212_s4 + $0xf0] ss:$8 sps:$4 sm:$0xff]  }
  0x41   : > { %568 = vmatpush1.bf16.msra.mxu0 %v947_v8  ;;  %608 = vmatprep.subr.bf16.mxu1 %v974_v18  ;;  %v995_v32 = vld [vmem:[%s1212_s4 + $0x120] ss:$8 sps:$4 sm:$0xff]   ;;  %v998_v33 = vld [vmem:[%s1212_s4 + $0x114] ss:$8 sps:$4 sm:$0xff]   ;;  %v972_v35 = vld [vmem:[%s1212_s4 + $0xe4] ss:$8 sps:$4 sm:$0xff]  }
  0x42   : > { %569 = vmatprep.subr.bf16.mxu0 %v948_v9  ;;  %v243_v34 = vld [vmem:[#allocation2] sm:$0xff]  ;;  %vm255_vm1 = vcmask 1045504   ;;  %vm250_vm2 = vcmask 1046528   ;;  %v976_v41 = vld [vmem:[%s1212_s4 + $0xe0] ss:$8 sps:$4 sm:$0xff]   ;;  %vm848_vm3 = vmneg %vm247_vm0  ;;  %s854_s16 = sadd.s32 4294967295, %s1093_s15 }
  0x43   : > { %v245_v36 = vrot.slane %v243_v34, 6  ;;  %v1001_v37 = vld [vmem:[%s1212_s4 + $0x110] ss:$8 sps:$4 sm:$0xff]   ;;  %v1004_v42 = vld [vmem:[%s1212_s4 + $0x104] ss:$8 sps:$4 sm:$0xff]   ;;  %vm850_vm4 = vmpackc.low %vm848_vm3, %vm848_vm3  ;;  %s655_s24 = ssub.s32 0, %s854_s16 }
  0x44   : > { %609 = vmatpush1.bf16.msra.mxu1 %v977_v19  ;;  %v978_v45 = vld [vmem:[%s1212_s4 + $0xd4] ss:$8 sps:$4 sm:$0xff]   ;;  %v1007_v47 = vld [vmem:[%s1212_s4 + $0x100] ss:$8 sps:$4 sm:$0xff]   ;;  %v982_v50 = vld [vmem:[%s1212_s4 + $0xd0] ss:$8 sps:$4 sm:$0xff]   ;;  %s855_s26 = smin.u32 %s854_s16, %s655_s24 }
  0x45   : > { %570 = vmatpush1.bf16.msra.mxu0 %v950_v10  ;;  %610 = vmatprep.subr.bf16.mxu1 %v980_v21  ;;  %v248_v38 = vsel %vm247_vm0, 0.0, %v245_v36  ;;  %v257_v39 = vrot.slane %v245_v36, 2  ;;  %v252_v40 = vrot.slane %v245_v36, 1  ;;  %v984_v51 = vld [vmem:[%s1212_s4 + $0xc4] ss:$8 sps:$4 sm:$0xff]   ;;  %v851_v62 = vpack.c.bf16 %v245_v36, %v245_v36  ;;  %p654_p11 = scmp.lt.s32.totalorder %s854_s16, 0 }
  0x46   : > { %571 = vmatprep.subr.bf16.mxu0 %v951_v13  ;;  %v256_v43 = vrot.slane %v248_v38, 2  ;;  %v251_v44 = vrot.slane %v248_v38, 1  ;;  %v988_v53 = vld [vmem:[%s1212_s4 + $0xc0] ss:$8 sps:$4 sm:$0xff]   ;;  %v990_v54 = vld [vmem:[%s1212_s4 + $0xb4] ss:$8 sps:$4 sm:$0xff]  }
  0x47   : > { %v994_v55 = vld [vmem:[%s1212_s4 + $0xb0] ss:$8 sps:$4 sm:$0xff]   ;;  %v996_v56 = vld [vmem:[%s1212_s4 + $0xa4] ss:$8 sps:$4 sm:$0xff]   ;;  %v1000_v57 = vld [vmem:[%s1212_s4 + $0xa0] ss:$8 sps:$4 sm:$0xff]  }
  0x48   : > { %611 = vmatpush1.bf16.msra.mxu1 %v983_v24  ;;  %v253_v46 = vsel %vm250_vm2, %v251_v44, %v252_v40  ;;  %v258_v48 = vsel %vm255_vm1, %v256_v43, %v257_v39  ;;  %v1002_v58 = vld [vmem:[%s1212_s4 + $0x94] ss:$8 sps:$4 sm:$0xff]   ;;  %v1006_v59 = vld [vmem:[%s1212_s4 + $0x90] ss:$8 sps:$4 sm:$0xff]   ;;  %v1008_v60 = vld [vmem:[%s1212_s4 + $0x84] ss:$8 sps:$4 sm:$0xff]  }
  0x49   : > { %572 = vmatpush1.bf16.msra.mxu0 %v953_v16  ;;  %612 = vmatprep.subr.bf16.mxu1 %v986_v25  ;;  %v261_v49 = vpack.c.bf16 %v253_v46, %v253_v46  ;;  %v262_v52 = vpack.c.bf16 %v258_v48, %v258_v48  ;;  %v1010_v61 = vld [vmem:[%s1212_s4 + $0x80] ss:$8 sps:$4 sm:$0xff]   ;;  %s657_s28 = sand.u32 1, %s855_s26   ;;  %p652_p13 = scmp.ge.s32.totalorder %s1093_s15, 1  ;;  %v314_v4 = vshrl.u32 %v313_v3, 7 }
  0x4a   : > { %573 = vmatprep.subr.bf16.mxu0 %v954_v17  ;;  %s658_s30 = ssub.s32 0, %s657_s28  ;;  %v311_v6 = vld [vmem:[%s1228_s12] sm:$0x3] }
  0x4b   : > { %595 = vmatprep.mubr.bf16.mxu0 %v261_v49  ;;  %s1351_s30 = smov (!%p654_p11, %s658_s30), %s657_s28  ;;  %v319_v5 = vsub.s32 1, %v314_v4  ;;  %v315_v17 = vsub.s32 0, %v314_v4 }
  0x4c   : > { %613 = vmatpush1.bf16.msra.mxu1 %v989_v27  ;;  %p857_p12 = scmp.lt.s32.totalorder %s1351_s30, 0  ;;  %s664_s29 = sadd.s32 2, %s1351_s30 }
  0x4d   : > { %574 = vmatpush1.bf16.msra.mxu0 %v956_v20  ;;  %614 = vmatprep.subr.bf16.mxu1 %v992_v29  ;;  %v320_v7 = vrot.slane %v311_v6, %v319_v5  ;;  %v316_v18 = vrot.slane %v311_v6, %v315_v17 }
  0x4e   : > { %575 = vmatprep.subr.bf16.mxu0 %v957_v22  ;;  %s1353_s29 = smov (!%p857_p12, %s664_s29), %s1351_s30 }
  0x4f   : > { %p666_p0 = scmp.eq.s32.totalorder %s1353_s29, 0 }
  0x50   : > { %615 = vmatpush1.bf16.msra.mxu1 %v995_v32 }
  0x51   : > { %576 = vmatpush1.bf16.msra.mxu0 %v959_v23  ;;  %616 = vmatprep.subr.bf16.mxu1 %v998_v33  ;;  %p1291_p1 = pnand %p666_p0, %p652_p13 }
  0x52   : > { %577 = vmatprep.subr.bf16.mxu0 %v960_v26 }
  0x54   : > { %617 = vmatpush1.bf16.msra.mxu1 %v1001_v37 }
  0x55   : > { %578 = vmatpush1.bf16.msra.mxu0 %v964_v28  ;;  %618 = vmatprep.subr.bf16.mxu1 %v1004_v42 }
  0x56   : > { %579 = vmatprep.subr.bf16.mxu0 %v966_v30 }
  0x58   : > { %619 = vmatpush1.bf16.msra.mxu1 %v1007_v47 }
  0x59   : > { %580 = vmatpush2.bf16.msra.mxu0 %v970_v31 }
  0x5a   : > { %581 = vmatprep.subr.bf16.mxu0 %v972_v35 }
  0x5b   : > { %637 = vmatmul.mubr.bf16.vlgmr.msra.gmra.mxu1 %v262_v52 }
  0x5d   : > { %582 = vmatpush2.bf16.msra.mxu0 %v976_v41 }
  0x5e   : > { %583 = vmatprep.subr.bf16.mxu0 %v978_v45 }
  0x61   : > { %584 = vmatpush2.bf16.msra.mxu0 %v982_v50 }
  0x62   : > { %585 = vmatprep.subr.bf16.mxu0 %v984_v51 }
  0x65   : > { %586 = vmatpush2.bf16.msra.mxu0 %v988_v53 }
  0x66   : > { %587 = vmatprep.subr.bf16.mxu0 %v990_v54 }
  0x69   : > { %588 = vmatpush2.bf16.msra.mxu0 %v994_v55 }
  0x6a   : > { %589 = vmatprep.subr.bf16.mxu0 %v996_v56 }
  0x6d   : > { %590 = vmatpush2.bf16.msra.mxu0 %v1000_v57 }
  0x6e   : > { %591 = vmatprep.subr.bf16.mxu0 %v1002_v58 }
  0x71   : > { %592 = vmatpush2.bf16.msra.mxu0 %v1006_v59 }
  0x72   : > { %593 = vmatprep.subr.bf16.mxu0 %v1008_v60 }
  0x75   : > { %594 = vmatpush2.bf16.msra.mxu0 %v1010_v61 }
  0x78   : > { %852 = vmatmul.mubr.msk.bf16.vlgmr.msra.gmra.mxu0 %vm850_vm4, %v851_v62 }
 0x11b   : > { %v638_v63 = vpop.f32.mrf.mxu1 }
 0x11d   : > { %v640_v0 = vpop.f32.mrf.mxu1 }
 0x11f   : > { %v642_v1 = vpop.f32.mrf.mxu1 }
 0x121   : > { %v643_v2 = vpop.f32.mrf.mxu1 }
 0x138   : > { %v597_v8 = vpop.f32.mrf.mxu0 }
 0x139   : > { %v598_v19 = vadd.f32 %v597_v8, %v316_v18 }
 0x13a   : > { %v599_v9 = vpop.f32.mrf.mxu0 }
 0x13b   : > { %v600_v10 = vadd.f32 %v599_v9, %v320_v7  ;;  %v639_v20 = vadd.f32 %v638_v63, %v598_v19 }
 0x13c   : > { %v601_v11 = vpop.f32.mrf.mxu0 }
 0x13d   : > { %v641_v12 = vadd.f32 %v640_v0, %v600_v10 }
 0x13e   : > { %v602_v13 = vpop.f32.mrf.mxu0 }
 0x13f   : > { %v853_v14 = vmul.f32 -1.442695, %v641_v12 }
 0x141   : > { %1011 = vpow2.f32 %v853_v14 }
 0x14e   : > { %v1012_v15 = vpop.eup %1011 }
 0x14f   : > { %v648_v16 = vadd.f32 1.0, %v1012_v15 }
 0x151   : > { %1013 = vrcp.f32 %v648_v16 }
 0x15b   : > { %670 = sbr.rel (%p1291_p1) target bundleno = 356 (0x164), region = 44 }
 0x15e   : > { %v1014_v21 = vpop.eup %1013 }
 0x15f   : > { %v651_v22 = vmul.f32 %v1014_v21, %v639_v20 }
 0x160   : > { %v671_v23 = vld [vmem:[#allocation3] sm:$0xff] }
 0x161   : > { %v672_v24 = vadd.f32 %v671_v23, %v651_v22 }
 0x163   : > { %673 = vst [vmem:[#allocation2] sm:$0xff] %v672_v24  ;;  %674 = vst [vmem:[#allocation3] sm:$0xff] %v672_v24 }
 0x164 PF: > { %677 = sbr.rel (!%p1291_p1) target bundleno = 361 (0x169), region = 48  ;;  %678 = vst [vmem:[#allocation2] sm:$0xff] (%p1291_p1), %v651_v22 }
 0x169 PF: > { %681 = sbr.rel (%p799_p9) target bundleno = 367 (0x16f), region = 52 }
 0x16e   : > { %682 = vst [vmem:[#allocation3] sm:$0xff] %v651_v22 }
 0x16f PF: > { %p859_p2 = scmp.ne.s32.totalorder %s1093_s15, 3 }
 0x171   : > { %686 = sbr.rel (%p859_p2) target bundleno = 378 (0x17a), region = 56 }
 0x176   : > { %v687_v25 = vld [vmem:[#allocation2] sm:$0xff] }
 0x177   : > { %v688_v26 = vpack.c.bf16 %v687_v25, %v687_v25 }
 0x179   : > { %689 = vst [vmem:[%s1233_s23] sm:$0xf] %v688_v26 }
 0x17a PF: > { %s16_s19 = sadd.s32 1, %s1109_s19   ;;  %s1335_s12 = smov %s1085_s13 }
 0x17b   : > { %p13_p3 = scmp.ge.s32.totalorder %s16_s19, 10   ;;  %s1336_s13 = smov %s1089_s14 }
 0x17c   : > { %s1337_s14 = smov %s1189_s25  ;;  %s1338_s15 = smov %s1101_s17 }
 0x17d   : > { %s1339_s16 = smov %s1105_s18  ;;  %s1340_s17 = smov %s1343_s21 }
 0x17e   : > { %s1341_s18 = smov %s1347_s22  ;;  %15 = sbr.rel (!%p13_p3) target bundleno = 5 (0x5), region = 98 }
 0x183   :  { %709 = vsyncpa [#allocation5], 1 }
 0x184   :  { %711 = vsyncpa [#allocation5 + $0x1], 1 }

</bundles_post_ra>
